<compile_context>
chip_gen: v6e
topology: v6e:2x2x1
jax: 0.10.0
libtpu: 0.0.40
codegen_flags: <defaults>
</compile_context>

<pallas_src>
import jax
import jax.numpy as jnp
from jax.experimental import pallas as pl
from jax.experimental.pallas import tpu as pltpu


def _round_up(x, m):
    return ((x + m - 1) // m) * m


def _mean_pool_kernel(x_ref, m_ref, o_ref, acc_ref, cnt_ref):
    # x_ref:   (TB, TS, H)   hidden states tile
    # m_ref:   (TB, TS, 1)   mask tile (native dtype), S on sublanes
    # o_ref:   (TB, H)       output tile (resident across the S grid axis)
    # acc_ref: (TB, H) f32   running masked sum
    # cnt_ref: (TB, 1) f32   running mask count
    k = pl.program_id(1)

    @pl.when(k == 0)
    def _init():
        acc_ref[...] = jnp.zeros_like(acc_ref)
        cnt_ref[...] = jnp.zeros_like(cnt_ref)

    m = m_ref[...].astype(jnp.float32)                     # (TB, TS, 1)
    x = x_ref[...].astype(jnp.float32)                     # (TB, TS, H)
    acc_ref[...] += jnp.sum(x * m, axis=1)                 # (TB, H)
    cnt_ref[...] += jnp.sum(m, axis=1)                     # (TB, 1)

    @pl.when(k == pl.num_programs(1) - 1)
    def _finalize():
        # One reciprocal per row (EUP slot) + broadcast multiply on the VPU.
        inv = pl.reciprocal(jnp.maximum(cnt_ref[...], 1e-9))
        o_ref[...] = (acc_ref[...] * inv).astype(o_ref.dtype)


def mean_pooling(last_hidden_state, attention_mask=None):
    """Masked mean pooling over the sequence axis.

    last_hidden_state: (B, S, H)
    attention_mask:    (B, S), any dtype; ones if None
    returns:           (B, H) float32
    """
    B, S, H = last_hidden_state.shape
    if attention_mask is None:
        attention_mask = jnp.ones((B, S), dtype=last_hidden_state.dtype)

    # Mask with S on the sublane axis; keep native dtype (cast inside the kernel).
    mask3 = attention_mask.reshape(B, S, 1)

    # --- Tile selection -----------------------------------------------------
    # Batch tile: >=8 sublanes when possible so mask/output blocks are aligned.
    TB = 8 if B >= 8 else B

    # Sequence tile: bound the per-buffer working set to ~2 MiB counting both
    # the x tile and the mask tile (whose lane dim of 1 pads to 128 lanes in
    # VMEM), so 2 inputs x 2 pipeline buffers stay far below the v5e default
    # scoped VMEM (16 MiB) and v7x's 64 MiB physical VMEM.
    x_itemsize = jnp.dtype(last_hidden_state.dtype).itemsize
    budget_bytes = 2 * 1024 * 1024
    bytes_per_seq_row = TB * (H * x_itemsize + 128 * 4)
    ts_cap = max(8, (budget_bytes // max(1, bytes_per_seq_row)) // 8 * 8)
    TS = int(max(8, min(_round_up(S, 8), ts_cap)))

    # Pad B/S so the tiles divide evenly.  Padded mask entries are zero, so
    # padded rows/positions contribute nothing to the sums.
    B_pad = _round_up(B, TB)
    S_pad = _round_up(S, TS)
    x = last_hidden_state
    if B_pad != B or S_pad != S:
        x = jnp.pad(x, ((0, B_pad - B), (0, S_pad - S), (0, 0)))
        mask3 = jnp.pad(mask3, ((0, B_pad - B), (0, S_pad - S), (0, 0)))

    grid = (B_pad // TB, S_pad // TS)

    out = pl.pallas_call(
        _mean_pool_kernel,
        out_shape=jax.ShapeDtypeStruct((B_pad, H), jnp.float32),
        grid_spec=pltpu.PrefetchScalarGridSpec(
            num_scalar_prefetch=0,
            grid=grid,
            in_specs=[
                pl.BlockSpec((TB, TS, H), lambda b, k: (b, k, 0)),
                pl.BlockSpec((TB, TS, 1), lambda b, k: (b, k, 0)),
            ],
            # Output block constant across the reduction axis k -> stays
            # resident in VMEM; only written at the last k step.
            out_specs=pl.BlockSpec((TB, H), lambda b, k: (b, 0)),
            scratch_shapes=[
                pltpu.VMEM((TB, H), jnp.float32),   # masked-sum accumulator
                pltpu.VMEM((TB, 1), jnp.float32),   # mask-count accumulator
            ],
        ),
        compiler_params=pltpu.CompilerParams(
            dimension_semantics=("parallel", "arbitrary"),
        ),
    )(x, mask3)

    return out[:B]


def _reference(last_hidden_state, attention_mask=None):
    if attention_mask is None:
        attention_mask = jnp.ones(last_hidden_state.shape[:-1], dtype=jnp.float32)
    m = attention_mask.astype(jnp.float32)[..., None]
    sum_emb = jnp.sum(last_hidden_state.astype(jnp.float32) * m, axis=1)
    sum_mask = jnp.maximum(jnp.sum(m, axis=1), 1e-9)
    return sum_emb / sum_mask


if __name__ == "__main__":
    key = jax.random.PRNGKey(0)
    k1, k2, k3 = jax.random.split(key, 3)

    # Case 1: small (B=2, S=8, H=32) with padded sequence tails.
    B, S, H = 2, 8, 32
    x1 = jax.random.normal(k1, (B, S, H), dtype=jnp.float32)
    lengths = jnp.array([6, 3], dtype=jnp.int32)
    mask1 = (jnp.arange(S)[None, :] < lengths[:, None]).astype(jnp.float32)
    out1 = jax.block_until_ready(mean_pooling(x1, mask1))
    ref1 = _reference(x1, mask1)
    assert out1.shape == (B, H)
    assert jnp.allclose(out1, ref1, atol=1e-5, rtol=1e-5), "mismatch vs reference"

    # Case 2: attention_mask=None path.
    out2 = jax.block_until_ready(mean_pooling(x1, None))
    ref2 = _reference(x1, None)
    assert jnp.allclose(out2, ref2, atol=1e-5, rtol=1e-5), "mismatch (mask=None)"

    # Case 3: shapes that exercise batch/sequence padding, a multi-step grid
    # (TB=8 batch blocking), and an integer-typed mask cast inside the kernel.
    B3, S3, H3 = 9, 20, 32
    x3 = jax.random.normal(k2, (B3, S3, H3), dtype=jnp.float32)
    lengths3 = jax.random.randint(k3, (B3,), 1, S3 + 1)
    mask3 = (jnp.arange(S3)[None, :] < lengths3[:, None]).astype(jnp.int32)
    out3 = jax.block_until_ready(mean_pooling(x3, mask3))
    ref3 = _reference(x3, mask3)
    assert out3.shape == (B3, H3)
    assert jnp.allclose(out3, ref3, atol=1e-5, rtol=1e-5), "mismatch (padded case)"

    print("KERNEL_OK")
</pallas_src>

<mosaic_0001>
module attributes {stable_mosaic.version = 11 : i64} {
  func.func @_mean_pool_kernel(%arg0: i32, %arg1: i32, %arg2: memref<2x8x32xf32, #tpu.memory_space<vmem>>, %arg3: memref<2x8x1xf32, #tpu.memory_space<vmem>>, %arg4: memref<2x32xf32, #tpu.memory_space<vmem>>, %arg5: memref<2x32xf32, #tpu.memory_space<vmem>>, %arg6: memref<2x1xf32, #tpu.memory_space<vmem>>) attributes {dimension_semantics = [#tpu.dimension_semantics<parallel>, #tpu.dimension_semantics<arbitrary>], iteration_bounds = array<i64: 1, 1>, scalar_prefetch = 0 : i64, scratch_operands = 2 : i64, tpu.core_type = #tpu.core_type<tc>, window_params = [{transform_indices = @transform_0, window_bounds = array<i64: 2, 8, 32>}, {transform_indices = @transform_1, window_bounds = array<i64: 2, 8, 1>}, {transform_indices = @transform_2, window_bounds = array<i64: 2, 32>}]} {
    %c0_i32 = arith.constant 0 : i32
    %0 = arith.cmpi eq, %arg1, %c0_i32 : i32
    %1 = arith.extui %0 : i1 to i32
    %c0_i32_0 = arith.constant 0 : i32
    %2 = arith.cmpi ne, %1, %c0_i32_0 : i32
    scf.if %2 {
      %cst_17 = arith.constant 0.000000e+00 : f32
      %18 = vector.broadcast %cst_17 : f32 to vector<2x32xf32>
      %c0_18 = arith.constant 0 : index
      %c0_19 = arith.constant 0 : index
      %19 = vector.load %arg5[%c0_18, %c0_19] : memref<2x32xf32, #tpu.memory_space<vmem>>, vector<2x32xf32>
      tpu.vector_store %arg5[%c0_18, %c0_19], %18 {strides = array<i32>} : memref<2x32xf32, #tpu.memory_space<vmem>>, vector<2x32xf32>,
      %cst_20 = arith.constant 0.000000e+00 : f32
      %20 = vector.broadcast %cst_20 : f32 to vector<2x1xf32>
      %c0_21 = arith.constant 0 : index
      %c0_22 = arith.constant 0 : index
      %21 = vector.load %arg6[%c0_21, %c0_22] : memref<2x1xf32, #tpu.memory_space<vmem>>, vector<2x1xf32>
      tpu.vector_store %arg6[%c0_21, %c0_22], %20 {strides = array<i32>} : memref<2x1xf32, #tpu.memory_space<vmem>>, vector<2x1xf32>,
    } else {
    }
    %c0 = arith.constant 0 : index
    %c0_1 = arith.constant 0 : index
    %c0_2 = arith.constant 0 : index
    %3 = vector.load %arg3[%c0, %c0_1, %c0_2] : memref<2x8x1xf32, #tpu.memory_space<vmem>>, vector<2x8x1xf32>
    %c0_3 = arith.constant 0 : index
    %c0_4 = arith.constant 0 : index
    %c0_5 = arith.constant 0 : index
    %4 = vector.load %arg2[%c0_3, %c0_4, %c0_5] : memref<2x8x32xf32, #tpu.memory_space<vmem>>, vector<2x8x32xf32>
    %c0_6 = arith.constant 0 : index
    %c0_7 = arith.constant 0 : index
    %5 = vector.load %arg5[%c0_6, %c0_7] : memref<2x32xf32, #tpu.memory_space<vmem>>, vector<2x32xf32>
    %6 = vector.broadcast %3 : vector<2x8x1xf32> to vector<2x8x32xf32>
    %7 = arith.mulf %4, %6 : vector<2x8x32xf32>
    %cst = arith.constant dense<0.000000e+00> : vector<2x32xf32>
    %8 = vector.multi_reduction <add>, %7, %cst [1] : vector<2x8x32xf32> to vector<2x32xf32>
    %9 = arith.addf %5, %8 : vector<2x32xf32>
    %c0_8 = arith.constant 0 : index
    %c0_9 = arith.constant 0 : index
    %10 = vector.load %arg5[%c0_8, %c0_9] : memref<2x32xf32, #tpu.memory_space<vmem>>, vector<2x32xf32>
    tpu.vector_store %arg5[%c0_8, %c0_9], %9 {strides = array<i32>} : memref<2x32xf32, #tpu.memory_space<vmem>>, vector<2x32xf32>,
    %c0_10 = arith.constant 0 : index
    %c0_11 = arith.constant 0 : index
    %11 = vector.load %arg6[%c0_10, %c0_11] : memref<2x1xf32, #tpu.memory_space<vmem>>, vector<2x1xf32>
    %cst_12 = arith.constant dense<0.000000e+00> : vector<2x1xf32>
    %12 = vector.multi_reduction <add>, %3, %cst_12 [1] : vector<2x8x1xf32> to vector<2x1xf32>
    %13 = arith.addf %11, %12 : vector<2x1xf32>
    %c0_13 = arith.constant 0 : index
    %c0_14 = arith.constant 0 : index
    %14 = vector.load %arg6[%c0_13, %c0_14] : memref<2x1xf32, #tpu.memory_space<vmem>>, vector<2x1xf32>
    tpu.vector_store %arg6[%c0_13, %c0_14], %13 {strides = array<i32>} : memref<2x1xf32, #tpu.memory_space<vmem>>, vector<2x1xf32>,
    %c0_i32_15 = arith.constant 0 : i32
    %15 = arith.cmpi eq, %arg1, %c0_i32_15 : i32
    %16 = arith.extui %15 : i1 to i32
    %c0_i32_16 = arith.constant 0 : i32
    %17 = arith.cmpi ne, %16, %c0_i32_16 : i32
    scf.if %17 {
      %c0_17 = arith.constant 0 : index
      %c0_18 = arith.constant 0 : index
      %18 = vector.load %arg6[%c0_17, %c0_18] : memref<2x1xf32, #tpu.memory_space<vmem>>, vector<2x1xf32>
      %cst_19 = arith.constant 9.99999971E-10 : f32
      %19 = vector.broadcast %cst_19 : f32 to vector<2x1xf32>
      %20 = arith.maximumf %18, %19 : vector<2x1xf32>
      %21 = tpu.reciprocal %20 : vector<2x1xf32> -> vector<2x1xf32>
      %c0_20 = arith.constant 0 : index
      %c0_21 = arith.constant 0 : index
      %22 = vector.load %arg5[%c0_20, %c0_21] : memref<2x32xf32, #tpu.memory_space<vmem>>, vector<2x32xf32>
      %23 = vector.broadcast %21 : vector<2x1xf32> to vector<2x32xf32>
      %24 = arith.mulf %22, %23 : vector<2x32xf32>
      %c0_22 = arith.constant 0 : index
      %c0_23 = arith.constant 0 : index
      %25 = vector.load %arg4[%c0_22, %c0_23] : memref<2x32xf32, #tpu.memory_space<vmem>>, vector<2x32xf32>
      tpu.vector_store %arg4[%c0_22, %c0_23], %24 {strides = array<i32>} : memref<2x32xf32, #tpu.memory_space<vmem>>, vector<2x32xf32>,
    } else {
    }
    return
  }
  func.func @transform_0(%arg0: i32, %arg1: i32) -> (i32, i32, i32) {
    %c0_i32 = arith.constant 0 : i32
    %c0_i32_0 = arith.constant 0 : i32
    return %arg0, %arg1, %c0_i32 : i32, i32, i32
  }
  func.func @transform_1(%arg0: i32, %arg1: i32) -> (i32, i32, i32) {
    %c0_i32 = arith.constant 0 : i32
    %c0_i32_0 = arith.constant 0 : i32
    return %arg0, %arg1, %c0_i32 : i32, i32, i32
  }
  func.func @transform_2(%arg0: i32, %arg1: i32) -> (i32, i32) {
    %c0_i32 = arith.constant 0 : i32
    %c0_i32_0 = arith.constant 0 : i32
    return %arg0, %c0_i32 : i32, i32
  }
}

</mosaic_0001>

<bundles_post_ra>
// kernel: tpu_custom_call.1
= control target key start
LH: loop header
LB: loop body
LE: loop exit
PB: predicated region body
PF: predicated region fallthrough
CT: control target
= control target key end

     0   :  { %vm61_vm0 = vcmask 7168   ;;  %v140_v2 = vmov 0   ;;  %vm18_vm1 = vcmask 1024   ;;  %v141_v7 = vmov 0.0   ;;  %s180_s0 = inlined_call_operand.vmem [shape: f32[2,8,32], index: 0, kind: input, shape index: {}]   ;;  %s181_s1 = inlined_call_operand.vmem [shape: f32[2,8,1], index: 1, kind: input, shape index: {}]   ;;  %s182_s2 = inlined_call_operand.hbm [shape: f32[2,32], index: 2, kind: output, shape index: {}]  }
   0x1   :  { %v20_v0 = vld [vmem:[%s181_s1] sm:$0xff]  ;;  %v21_v1 = vld [vmem:[%s181_s1 + $0x8] sm:$0xff]  ;;  %114 = vset.pattern.permute.xlu0 %v140_v2  ;;  %115 = vset.pattern.permute.xlu1 %v140_v2  ;;  %19 = vst.msk [vmem:[#allocation3] sm:$0x3] %vm18_vm1, %v141_v7 }
   0x2   :  { %v62_v3 = vsel %vm61_vm0, %v20_v0, 0.0  ;;  %v69_v4 = vsel %vm61_vm0, %v21_v1, 0.0  ;;  %27 = vperm.xlu0 %114, %v20_v0  }
   0x3   :  { %v63_v5 = vrot.slane %v62_v3, 4  ;;  %v70_v6 = vrot.slane %v69_v4, 4 }
   0x4   :  { %7 = vsyncpa [#allocation5], 0  ;;  %vm16_vm2 = vcmask 254976   ;;  %vm54_vm3 = vcmask 1041409   ;;  %v22_v24 = vld [vmem:[%s180_s0] sm:$0xff]  ;;  %vm37_vm4 = vcmask 261120  }
   0x5   :  { %v64_v8 = vadd.f32 %v63_v5, %v62_v3  ;;  %v71_v9 = vadd.f32 %v70_v6, %v69_v4  ;;  %17 = vst.msk [vmem:[#allocation2] sm:$0x3] %vm16_vm2, %v141_v7  ;;  %v23_v27 = vld [vmem:[%s180_s0 + $0x8] sm:$0xff]  ;;  %s142_s0 = smov [#allocation4]  }
   0x6   :  { %32 = vperm.xlu0 %114, %v21_v1   ;;  %s103_s16 = sshll.u32 %s142_s0, 4  ;;  %s104_s16 = int_to_ptr.vmem [resolvable:$true] %s103_s16 }
   0x7   :  { %v65_v10 = vrot.slane %v64_v8, 2  ;;  %v72_v11 = vrot.slane %v71_v9, 2  ;;  %s118_s17 = scalar_lea.vmem %s104_s16, 32  ;;  %p123_p1 = scmp.lt.s32.totalorder %s104_s16, %s104_s16 }
   0x8   :  { %v60_v18 = vld [vmem:[#allocation3] sm:$0x3]  ;;  %p119_p0 = scmp.ne.s32.totalorder %s104_s16, %s118_s17  ;;  %p124_p2 = scmp.lt.s32.totalorder %s118_s17, %s118_s17 }
   0x9   :  { %v66_v12 = vadd.f32 %v65_v10, %v64_v8  ;;  %v73_v13 = vadd.f32 %v72_v11, %v71_v9 }
   0xa   :  { %p125_p3 = por %p124_p2, %p123_p1 }
   0xb   :  { %v67_v14 = vrot.slane %v66_v12, 1  ;;  %v74_v15 = vrot.slane %v73_v13, 1 }
   0xc   :  { %v24_v44 = vld [vmem:[#allocation2] sm:$0x3]  ;;  %p126_p4 = pnand %p125_p3, %p119_p0 }
   0xd   :  { %v68_v16 = vadd.f32 %v67_v14, %v66_v12  ;;  %v75_v17 = vadd.f32 %v74_v15, %v73_v13 }
   0xf   :  { %v78_v19 = vsel %vm54_vm3, %v75_v17, %v68_v16 }
  0x10   :  { %v80_v20 = vadd.f32 %v78_v19, %v60_v18 }
  0x12   :  { %82 = vst.msk [vmem:[#allocation3] sm:$0x3] %vm18_vm1, %v80_v20 }
  0x19   :  { %v86_v21 = vld [vmem:[#allocation3] sm:$0x3] }
  0x1a   :  { %v87_v22 = vmax.f32 %v86_v21, 1e-09 }
  0x1c   :  { %116 = vrcp.f32 %v87_v22 }
  0x29   :  { %v117_v23 = vpop.eup %116 }
  0x2a   :  { %92 = vperm.xlu1 %115, %v117_v23  }
  0x7d   :  { %v28_v25 = vpop.permute.xlu0 %27 }
  0x7e   :  { %v35_v26 = vmul.f32 %v28_v25, %v22_v24 }
  0x80   :  { %v38_v28 = vsel %vm37_vm4, %v35_v26, 0.0 }
  0x81   :  { %v39_v29 = vrot.slane %v38_v28, 4  ;;  %v33_v30 = vpop.permute.xlu0 %32 }
  0x82   :  { %v36_v31 = vmul.f32 %v33_v30, %v23_v27 }
  0x83   :  { %v40_v32 = vadd.f32 %v39_v29, %v38_v28 }
  0x84   :  { %v45_v33 = vsel %vm37_vm4, %v36_v31, 0.0 }
  0x85   :  { %v41_v34 = vrot.slane %v40_v32, 2  ;;  %v46_v35 = vrot.slane %v45_v33, 4 }
  0x87   :  { %v42_v36 = vadd.f32 %v41_v34, %v40_v32  ;;  %v47_v37 = vadd.f32 %v46_v35, %v45_v33 }
  0x89   :  { %v43_v38 = vrot.slane %v42_v36, 1  ;;  %v48_v39 = vrot.slane %v47_v37, 2 }
  0x8b   :  { %v49_v40 = vadd.f32 %v48_v39, %v47_v37  ;;  %v44_v41 = vadd.f32 %v43_v38, %v42_v36 }
  0x8d   :  { %v50_v42 = vrot.slane %v49_v40, 1 }
  0x8f   :  { %v51_v43 = vadd.f32 %v50_v42, %v49_v40 }
  0x91   :  { %v55_v45 = vsel %vm54_vm3, %v51_v43, %v44_v41 }
  0x92   :  { %v57_v46 = vadd.f32 %v55_v45, %v24_v44 }
  0x94   :  { %59 = vst.msk [vmem:[#allocation2] sm:$0x3] %vm16_vm2, %v57_v46 }
  0x9b   :  { %v89_v48 = vld [vmem:[#allocation2] sm:$0x3] }
  0xa5   :  { %v93_v47 = vpop.permute.xlu1 %92 }
  0xa6   :  { %v95_v49 = vmul.f32 %v93_v47, %v89_v48 }
  0xa8   :  { %96 = vst.msk [vmem:[#allocation4] sm:$0x3] %vm16_vm2, %v95_v49 }
  0xa9   :  { %129 = shalt.err (!%p126_p4)
}
  0xaa   :  { %106 = dma.vmem_to_hbm [thread:$0]  %s104_s16, 32, %s182_s2, [#allocation5]  }
  0xab   :  { %138 = dma.done.wait [#allocation5], 32  }
  0xac   :  { %139 = vsyncadd [#allocation5], 4294967264 }
  0xad   :  { %110 = vsyncpa [#allocation5], 1 }

</bundles_post_ra>
